<compile_context>
chip_gen: v7x
topology: tpu7x:2x2x1
jax: 0.10.0
libtpu: 0.0.40
codegen_flags: <defaults>
</compile_context>

<pallas_src>
import jax
import jax.numpy as jnp
from jax.experimental import pallas as pl
from jax.experimental.pallas import tpu as pltpu


def decoder_2sig_kernel(x_ref,
                        w0_ref, b0_ref,
                        w1_ref, b1_ref,
                        w2_ref, b2_ref,
                        w3_ref, b3_ref,
                        w4_ref, b4_ref,
                        o_ref):
    """Fused MLP: 4 x (matmul + bias + ReLU), final matmul + bias, 2*sigmoid."""
    x = x_ref[...]
    mm_dtype = w0_ref.dtype          # matmul operand dtype (bf16 by default)

    def linear_relu(h, w_ref, b_ref):
        y = jnp.dot(h.astype(mm_dtype), w_ref[...],
                    preferred_element_type=jnp.float32)   # f32 accumulation
        y = y + b_ref[...]            # bias (1, out) broadcasts over batch rows
        return jnp.maximum(y, 0.0)    # ReLU, in f32

    h = linear_relu(x, w0_ref, b0_ref)
    h = linear_relu(h, w1_ref, b1_ref)
    h = linear_relu(h, w2_ref, b2_ref)
    h = linear_relu(h, w3_ref, b3_ref)

    logits = jnp.dot(h.astype(mm_dtype), w4_ref[...],
                     preferred_element_type=jnp.float32)
    logits = logits + b4_ref[...]
    # 2 * sigmoid(x) == 1 + tanh(x / 2): one EUP push + one FMA (no divide).
    o_ref[...] = (1.0 + jnp.tanh(0.5 * logits)).astype(o_ref.dtype)


def _pad_params_lane_dense(params, lane=128):
    """Zero-pad every layer's output feature dim (and the matching next-layer
    input dim) up to a multiple of `lane`.  Exact: padded columns have zero
    weight and zero bias, so padded activations are 0 and contribute nothing."""
    padded = []
    prev_out_pad = 0
    for (w, b) in params:
        fan_in, fan_out = w.shape
        in_pad = prev_out_pad
        out_pad = (-fan_out) % lane
        w_p = jnp.pad(w, ((0, in_pad), (0, out_pad)))
        b_p = jnp.pad(b, ((0, 0), (0, out_pad)))
        padded.append((w_p, b_p))
        prev_out_pad = out_pad
    return padded


def _round_up(n, m):
    return -(-n // m) * m


def _choose_block_batch(B):
    if B < 256:
        # One grid step covering the whole (sublane-rounded) batch: at these
        # sizes the kernel is dispatch/per-step-overhead bound.
        return max(8, _round_up(B, 8))
    # >= 2 "parallel" grid steps so the v7x megacore can shard the batch axis
    # (also harmless on single-TC v5e/v6e), with tiles capped at 512 rows.
    half = _round_up((B + 1) // 2, 8)
    return min(512, half)


def decoder_2sig_forward(x, params, *, block_batch=None, lane=128,
                         matmul_dtype=jnp.bfloat16, out_dtype=jnp.float32,
                         slice_output=True):
    """x: (B, latent_dim) f32.  params: list of (W_t, b), W_t (in, out), b (1, out),
    unpadded (PyTorch dims).  Returns (B, prod(inp_dim)) in `out_dtype`."""
    B, in_dim = x.shape
    out_dim = params[-1][0].shape[1]

    padded_params = _pad_params_lane_dense(params, lane=lane)
    padded_out = padded_params[-1][0].shape[1]

    # Cast weights (matmul operands) once; biases stay f32 for the VPU chain.
    padded_params = [(w.astype(matmul_dtype), b) for (w, b) in padded_params]

    if block_batch is None:
        block_batch = _choose_block_batch(B)
    grid = (pl.cdiv(B, block_batch),)

    # Batch-tiled x / output; weights & biases replicated (constant index_map)
    # and single-buffered since they never change across grid steps.
    in_specs = [pl.BlockSpec((block_batch, in_dim), lambda i: (i, 0))]
    flat_params = []
    for (w, b) in padded_params:
        in_specs.append(pl.BlockSpec(w.shape, lambda i: (0, 0),
                                     pipeline_mode=pl.Buffered(1)))
        in_specs.append(pl.BlockSpec(b.shape, lambda i: (0, 0),
                                     pipeline_mode=pl.Buffered(1)))
        flat_params += [w, b]

    out_specs = pl.BlockSpec((block_batch, padded_out), lambda i: (i, 0))

    # Advisory cost hint for XLA's scheduler around this small custom call.
    flops = 0
    bytes_accessed = int(x.size) * x.dtype.itemsize \
        + B * padded_out * jnp.dtype(out_dtype).itemsize
    for (w, b) in padded_params:
        flops += 2 * B * w.shape[0] * w.shape[1]
        bytes_accessed += int(w.size) * w.dtype.itemsize \
            + int(b.size) * b.dtype.itemsize
    cost = pl.CostEstimate(flops=flops,
                           transcendentals=B * padded_out,   # tanh epilogue
                           bytes_accessed=bytes_accessed)

    out = pl.pallas_call(
        decoder_2sig_kernel,
        out_shape=jax.ShapeDtypeStruct((B, padded_out), out_dtype),
        grid_spec=pl.GridSpec(
            grid=grid,
            in_specs=in_specs,
            out_specs=out_specs,
        ),
        compiler_params=pltpu.CompilerParams(
            dimension_semantics=("parallel",)),
        cost_estimate=cost,
    )(x, *flat_params)

    # Only materializes when prod(inp_dim) is not a multiple of 128.  Padded
    # columns hold 2*sigmoid(0) = 1.0, so skip the slice only if the consumer
    # views the first out_dim columns itself.
    if slice_output and padded_out != out_dim:
        out = out[:, :out_dim]
    return out


def init_decoder_2sig_params(key, latent_dim, hidden_size, inp_dim, no_layers=3):
    """Xavier-normal weights, zero biases; weights returned transposed (in, out),
    exactly matching the PyTorch module's layer dims (unpadded)."""
    out_dim = 1
    for d in inp_dim:
        out_dim *= d
    dims = [latent_dim] + [hidden_size] * (no_layers + 1) + [out_dim]
    params = []
    for i in range(len(dims) - 1):
        fan_in, fan_out = dims[i], dims[i + 1]
        key, sub = jax.random.split(key)
        std = (2.0 / (fan_in + fan_out)) ** 0.5
        # PyTorch stores W as (out, in); we build (in, out) directly (= W.T).
        w_t = std * jax.random.normal(sub, (fan_in, fan_out), dtype=jnp.float32)
        b = jnp.zeros((1, fan_out), dtype=jnp.float32)
        params.append((w_t, b))
    return params


def decoder_2sig_reference(x, params):
    """Pure-JAX reference (unpadded f32 params) for correctness checking."""
    h = x
    for (w, b) in params[:-1]:
        h = jnp.maximum(h @ w + b, 0.0)
    w, b = params[-1]
    return 2.0 * jax.nn.sigmoid(h @ w + b)


if __name__ == "__main__":
    # Small shapes consistent with the module: latent=8, hidden=32,
    # inp_dim=(1,16,16) -> output dim 256, no_layers=3, batch=16.
    latent_dim = 8
    hidden_size = 32
    inp_dim = (1, 16, 16)
    no_layers = 3
    batch = 16

    key = jax.random.PRNGKey(0)
    k_x, k_p = jax.random.split(key)

    x = jax.random.normal(k_x, (batch, latent_dim), dtype=jnp.float32)
    params = init_decoder_2sig_params(k_p, latent_dim, hidden_size, inp_dim,
                                      no_layers=no_layers)

    ref = decoder_2sig_reference(x, params)

    # Default (bf16 matmul operands, f32 accumulation & epilogue).
    out = decoder_2sig_forward(x, params)
    out = jax.block_until_ready(out)
    assert out.shape == (batch, 1 * 16 * 16)
    assert out.dtype == jnp.float32
    assert jnp.max(jnp.abs(out - ref)) < 5e-2, "bf16-matmul path mismatch"

    # Exact f32 path still available and bit-tight vs. reference.
    out_f32 = decoder_2sig_forward(x, params, matmul_dtype=jnp.float32)
    out_f32 = jax.block_until_ready(out_f32)
    assert jnp.max(jnp.abs(out_f32 - ref)) < 1e-4, "f32 path mismatch"

    print("KERNEL_OK")
</pallas_src>

<mosaic_0001>
module attributes {stable_mosaic.version = 11 : i64} {
  func.func @decoder_2sig_kernel(%arg0: i32, %arg1: memref<16x8xf32, #tpu.memory_space<vmem>>, %arg2: memref<8x128xbf16, #tpu.memory_space<vmem>>, %arg3: memref<1x128xf32, #tpu.memory_space<vmem>>, %arg4: memref<128x128xbf16, #tpu.memory_space<vmem>>, %arg5: memref<1x128xf32, #tpu.memory_space<vmem>>, %arg6: memref<128x128xbf16, #tpu.memory_space<vmem>>, %arg7: memref<1x128xf32, #tpu.memory_space<vmem>>, %arg8: memref<128x128xbf16, #tpu.memory_space<vmem>>, %arg9: memref<1x128xf32, #tpu.memory_space<vmem>>, %arg10: memref<128x256xbf16, #tpu.memory_space<vmem>>, %arg11: memref<1x256xf32, #tpu.memory_space<vmem>>, %arg12: memref<16x256xf32, #tpu.memory_space<vmem>>) attributes {dimension_semantics = [#tpu.dimension_semantics<parallel>], iteration_bounds = array<i64: 1>, scalar_prefetch = 0 : i64, scratch_operands = 0 : i64, tpu.core_type = #tpu.core_type<tc>, window_params = [{transform_indices = @transform_0, window_bounds = array<i64: 16, 8>}, {pipeline_mode = #tpu.pipeline_mode<synchronous>, transform_indices = @transform_1, window_bounds = array<i64: 8, 128>}, {pipeline_mode = #tpu.pipeline_mode<synchronous>, transform_indices = @transform_2, window_bounds = array<i64: 1, 128>}, {pipeline_mode = #tpu.pipeline_mode<synchronous>, transform_indices = @transform_3, window_bounds = array<i64: 128, 128>}, {pipeline_mode = #tpu.pipeline_mode<synchronous>, transform_indices = @transform_4, window_bounds = array<i64: 1, 128>}, {pipeline_mode = #tpu.pipeline_mode<synchronous>, transform_indices = @transform_5, window_bounds = array<i64: 128, 128>}, {pipeline_mode = #tpu.pipeline_mode<synchronous>, transform_indices = @transform_6, window_bounds = array<i64: 1, 128>}, {pipeline_mode = #tpu.pipeline_mode<synchronous>, transform_indices = @transform_7, window_bounds = array<i64: 128, 128>}, {pipeline_mode = #tpu.pipeline_mode<synchronous>, transform_indices = @transform_8, window_bounds = array<i64: 1, 128>}, {pipeline_mode = #tpu.pipeline_mode<synchronous>, transform_indices = @transform_9, window_bounds = array<i64: 128, 256>}, {pipeline_mode = #tpu.pipeline_mode<synchronous>, transform_indices = @transform_10, window_bounds = array<i64: 1, 256>}, {transform_indices = @transform_11, window_bounds = array<i64: 16, 256>}]} {
    %c0 = arith.constant 0 : index
    %c0_0 = arith.constant 0 : index
    %0 = vector.load %arg1[%c0, %c0_0] : memref<16x8xf32, #tpu.memory_space<vmem>>, vector<16x8xf32>
    %1 = arith.truncf %0 : vector<16x8xf32> to vector<16x8xbf16>
    %c0_1 = arith.constant 0 : index
    %c0_2 = arith.constant 0 : index
    %2 = vector.load %arg2[%c0_1, %c0_2] : memref<8x128xbf16, #tpu.memory_space<vmem>>, vector<8x128xbf16>
    %cst = arith.constant dense<0.000000e+00> : vector<16x128xf32>
    %3 = tpu.matmul %1, %2, %cst {dimension_numbers = #tpu.dot_dimension_numbers<[1], [0], [0], [1], [0, 0, 1, 1], [], []>} : vector<16x8xbf16>, vector<8x128xbf16>, vector<16x128xf32> -> vector<16x128xf32>
    %c0_3 = arith.constant 0 : index
    %c0_4 = arith.constant 0 : index
    %4 = vector.load %arg3[%c0_3, %c0_4] : memref<1x128xf32, #tpu.memory_space<vmem>>, vector<1x128xf32>
    %5 = vector.broadcast %4 : vector<1x128xf32> to vector<16x128xf32>
    %6 = arith.addf %3, %5 : vector<16x128xf32>
    %cst_5 = arith.constant 0.000000e+00 : f32
    %7 = vector.broadcast %cst_5 : f32 to vector<16x128xf32>
    %8 = arith.maximumf %6, %7 : vector<16x128xf32>
    %9 = arith.truncf %8 : vector<16x128xf32> to vector<16x128xbf16>
    %c0_6 = arith.constant 0 : index
    %c0_7 = arith.constant 0 : index
    %10 = vector.load %arg4[%c0_6, %c0_7] : memref<128x128xbf16, #tpu.memory_space<vmem>>, vector<128x128xbf16>
    %cst_8 = arith.constant dense<0.000000e+00> : vector<16x128xf32>
    %11 = tpu.matmul %9, %10, %cst_8 {dimension_numbers = #tpu.dot_dimension_numbers<[1], [0], [0], [1], [0, 0, 1, 1], [], []>} : vector<16x128xbf16>, vector<128x128xbf16>, vector<16x128xf32> -> vector<16x128xf32>
    %c0_9 = arith.constant 0 : index
    %c0_10 = arith.constant 0 : index
    %12 = vector.load %arg5[%c0_9, %c0_10] : memref<1x128xf32, #tpu.memory_space<vmem>>, vector<1x128xf32>
    %13 = vector.broadcast %12 : vector<1x128xf32> to vector<16x128xf32>
    %14 = arith.addf %11, %13 : vector<16x128xf32>
    %cst_11 = arith.constant 0.000000e+00 : f32
    %15 = vector.broadcast %cst_11 : f32 to vector<16x128xf32>
    %16 = arith.maximumf %14, %15 : vector<16x128xf32>
    %17 = arith.truncf %16 : vector<16x128xf32> to vector<16x128xbf16>
    %c0_12 = arith.constant 0 : index
    %c0_13 = arith.constant 0 : index
    %18 = vector.load %arg6[%c0_12, %c0_13] : memref<128x128xbf16, #tpu.memory_space<vmem>>, vector<128x128xbf16>
    %cst_14 = arith.constant dense<0.000000e+00> : vector<16x128xf32>
    %19 = tpu.matmul %17, %18, %cst_14 {dimension_numbers = #tpu.dot_dimension_numbers<[1], [0], [0], [1], [0, 0, 1, 1], [], []>} : vector<16x128xbf16>, vector<128x128xbf16>, vector<16x128xf32> -> vector<16x128xf32>
    %c0_15 = arith.constant 0 : index
    %c0_16 = arith.constant 0 : index
    %20 = vector.load %arg7[%c0_15, %c0_16] : memref<1x128xf32, #tpu.memory_space<vmem>>, vector<1x128xf32>
    %21 = vector.broadcast %20 : vector<1x128xf32> to vector<16x128xf32>
    %22 = arith.addf %19, %21 : vector<16x128xf32>
    %cst_17 = arith.constant 0.000000e+00 : f32
    %23 = vector.broadcast %cst_17 : f32 to vector<16x128xf32>
    %24 = arith.maximumf %22, %23 : vector<16x128xf32>
    %25 = arith.truncf %24 : vector<16x128xf32> to vector<16x128xbf16>
    %c0_18 = arith.constant 0 : index
    %c0_19 = arith.constant 0 : index
    %26 = vector.load %arg8[%c0_18, %c0_19] : memref<128x128xbf16, #tpu.memory_space<vmem>>, vector<128x128xbf16>
    %cst_20 = arith.constant dense<0.000000e+00> : vector<16x128xf32>
    %27 = tpu.matmul %25, %26, %cst_20 {dimension_numbers = #tpu.dot_dimension_numbers<[1], [0], [0], [1], [0, 0, 1, 1], [], []>} : vector<16x128xbf16>, vector<128x128xbf16>, vector<16x128xf32> -> vector<16x128xf32>
    %c0_21 = arith.constant 0 : index
    %c0_22 = arith.constant 0 : index
    %28 = vector.load %arg9[%c0_21, %c0_22] : memref<1x128xf32, #tpu.memory_space<vmem>>, vector<1x128xf32>
    %29 = vector.broadcast %28 : vector<1x128xf32> to vector<16x128xf32>
    %30 = arith.addf %27, %29 : vector<16x128xf32>
    %cst_23 = arith.constant 0.000000e+00 : f32
    %31 = vector.broadcast %cst_23 : f32 to vector<16x128xf32>
    %32 = arith.maximumf %30, %31 : vector<16x128xf32>
    %33 = arith.truncf %32 : vector<16x128xf32> to vector<16x128xbf16>
    %c0_24 = arith.constant 0 : index
    %c0_25 = arith.constant 0 : index
    %34 = vector.load %arg10[%c0_24, %c0_25] : memref<128x256xbf16, #tpu.memory_space<vmem>>, vector<128x256xbf16>
    %cst_26 = arith.constant dense<0.000000e+00> : vector<16x256xf32>
    %35 = tpu.matmul %33, %34, %cst_26 {dimension_numbers = #tpu.dot_dimension_numbers<[1], [0], [0], [1], [0, 0, 1, 1], [], []>} : vector<16x128xbf16>, vector<128x256xbf16>, vector<16x256xf32> -> vector<16x256xf32>
    %c0_27 = arith.constant 0 : index
    %c0_28 = arith.constant 0 : index
    %36 = vector.load %arg11[%c0_27, %c0_28] : memref<1x256xf32, #tpu.memory_space<vmem>>, vector<1x256xf32>
    %37 = vector.broadcast %36 : vector<1x256xf32> to vector<16x256xf32>
    %38 = arith.addf %35, %37 : vector<16x256xf32>
    %cst_29 = arith.constant 5.000000e-01 : f32
    %39 = vector.broadcast %cst_29 : f32 to vector<16x256xf32>
    %40 = arith.mulf %39, %38 : vector<16x256xf32>
    %41 = math.tanh %40 : vector<16x256xf32>
    %cst_30 = arith.constant 1.000000e+00 : f32
    %42 = vector.broadcast %cst_30 : f32 to vector<16x256xf32>
    %43 = arith.addf %42, %41 : vector<16x256xf32>
    %c0_31 = arith.constant 0 : index
    %c0_32 = arith.constant 0 : index
    %44 = vector.load %arg12[%c0_31, %c0_32] : memref<16x256xf32, #tpu.memory_space<vmem>>, vector<16x256xf32>
    tpu.vector_store %arg12[%c0_31, %c0_32], %43 {strides = array<i32>} : memref<16x256xf32, #tpu.memory_space<vmem>>, vector<16x256xf32>,
    return
  }
  func.func @transform_0(%arg0: i32) -> (i32, i32) {
    %c0_i32 = arith.constant 0 : i32
    %c0_i32_0 = arith.constant 0 : i32
    return %arg0, %c0_i32 : i32, i32
  }
  func.func @transform_1(%arg0: i32) -> (i32, i32) {
    %c0_i32 = arith.constant 0 : i32
    %c0_i32_0 = arith.constant 0 : i32
    %c0_i32_1 = arith.constant 0 : i32
    return %c0_i32, %c0_i32_0 : i32, i32
  }
  func.func @transform_2(%arg0: i32) -> (i32, i32) {
    %c0_i32 = arith.constant 0 : i32
    %c0_i32_0 = arith.constant 0 : i32
    %c0_i32_1 = arith.constant 0 : i32
    return %c0_i32, %c0_i32_0 : i32, i32
  }
  func.func @transform_3(%arg0: i32) -> (i32, i32) {
    %c0_i32 = arith.constant 0 : i32
    %c0_i32_0 = arith.constant 0 : i32
    %c0_i32_1 = arith.constant 0 : i32
    return %c0_i32, %c0_i32_0 : i32, i32
  }
  func.func @transform_4(%arg0: i32) -> (i32, i32) {
    %c0_i32 = arith.constant 0 : i32
    %c0_i32_0 = arith.constant 0 : i32
    %c0_i32_1 = arith.constant 0 : i32
    return %c0_i32, %c0_i32_0 : i32, i32
  }
  func.func @transform_5(%arg0: i32) -> (i32, i32) {
    %c0_i32 = arith.constant 0 : i32
    %c0_i32_0 = arith.constant 0 : i32
    %c0_i32_1 = arith.constant 0 : i32
    return %c0_i32, %c0_i32_0 : i32, i32
  }
  func.func @transform_6(%arg0: i32) -> (i32, i32) {
    %c0_i32 = arith.constant 0 : i32
    %c0_i32_0 = arith.constant 0 : i32
    %c0_i32_1 = arith.constant 0 : i32
    return %c0_i32, %c0_i32_0 : i32, i32
  }
  func.func @transform_7(%arg0: i32) -> (i32, i32) {
    %c0_i32 = arith.constant 0 : i32
    %c0_i32_0 = arith.constant 0 : i32
    %c0_i32_1 = arith.constant 0 : i32
    return %c0_i32, %c0_i32_0 : i32, i32
  }
  func.func @transform_8(%arg0: i32) -> (i32, i32) {
    %c0_i32 = arith.constant 0 : i32
    %c0_i32_0 = arith.constant 0 : i32
    %c0_i32_1 = arith.constant 0 : i32
    return %c0_i32, %c0_i32_0 : i32, i32
  }
  func.func @transform_9(%arg0: i32) -> (i32, i32) {
    %c0_i32 = arith.constant 0 : i32
    %c0_i32_0 = arith.constant 0 : i32
    %c0_i32_1 = arith.constant 0 : i32
    return %c0_i32, %c0_i32_0 : i32, i32
  }
  func.func @transform_10(%arg0: i32) -> (i32, i32) {
    %c0_i32 = arith.constant 0 : i32
    %c0_i32_0 = arith.constant 0 : i32
    %c0_i32_1 = arith.constant 0 : i32
    return %c0_i32, %c0_i32_0 : i32, i32
  }
  func.func @transform_11(%arg0: i32) -> (i32, i32) {
    %c0_i32 = arith.constant 0 : i32
    %c0_i32_0 = arith.constant 0 : i32
    return %arg0, %c0_i32 : i32, i32
  }
}

</mosaic_0001>

<bundles_post_ra>
// kernel: tpu_custom_call.1
= control target key start
LH: loop header
LB: loop body
LE: loop exit
PB: predicated region body
PF: predicated region fallthrough
CT: control target
= control target key end

     0   :  { %16 = vsyncpa [#allocation3], 0  ;;  %s1231_s0 = inlined_call_operand.vmem [shape: f32[16,8], index: 0, kind: input, shape index: {}]   ;;  %s1232_s1 = inlined_call_operand.vmem [shape: bf16[8,128], index: 1, kind: input, shape index: {}]   ;;  %s1233_s2 = inlined_call_operand.vmem [shape: f32[1,128], index: 2, kind: input, shape index: {}]   ;;  %s1234_s3 = inlined_call_operand.hbm [shape: bf16[128,128], index: 3, kind: input, shape index: {}]   ;;  %s1235_s4 = inlined_call_operand.vmem [shape: f32[1,128], index: 4, kind: input, shape index: {}]   ;;  %s1236_s5 = inlined_call_operand.hbm [shape: bf16[128,128], index: 5, kind: input, shape index: {}]   ;;  %s1237_s6 = inlined_call_operand.vmem [shape: f32[1,128], index: 6, kind: input, shape index: {}]   ;;  %s1238_s7 = inlined_call_operand.hbm [shape: bf16[128,128], index: 7, kind: input, shape index: {}]   ;;  %s1239_s8 = inlined_call_operand.vmem [shape: f32[1,128], index: 8, kind: input, shape index: {}]   ;;  %s1240_s9 = inlined_call_operand.hbm [shape: bf16[128,256], index: 9, kind: input, shape index: {}]   ;;  %s1241_s10 = inlined_call_operand.vmem [shape: f32[1,256], index: 10, kind: input, shape index: {}]   ;;  %s1242_s11 = inlined_call_operand.hbm [shape: f32[16,256], index: 11, kind: output, shape index: {}]  }
   0x1   :  { %17 = vsyncpa [#allocation6], 0 }
   0x2   :  { %18 = vsyncpa [#allocation9], 0 }
   0x3   :  { %19 = vsyncpa [#allocation4], 0  ;;  %s1017_s17 = smov [#allocation5]   ;;  %s1018_s19 = smov [#allocation2]  }
   0x4   :  { %s45_s18 = sshll.u32 %s1017_s17, 4  ;;  %s31_s20 = sshll.u32 %s1018_s19, 4  ;;  %s46_s18 = int_to_ptr.vmem [resolvable:$true] %s45_s18  ;;  %s1091_s20 = int_to_ptr.vmem [resolvable:$true] %s31_s20 }
   0x5   :  { %s899_s23 = scalar_lea.hbm %s1236_s5, 1024 }
   0x6   :  { %p900_p0 = scmp.ne.s32.totalorder %s1236_s5, %s899_s23  ;;  %p903_p1 = scmp.lt.u32.totalorder %s899_s23, %s1236_s5 }
   0x8   :  { %p905_p2 = pnand %p903_p1, %p900_p0 }
   0xa   :  { %908 = shalt.err (!%p905_p2)
}
   0xb   :  { %s909_s28 = scalar_lea.vmem %s46_s18, 1024  ;;  %p914_p4 = scmp.lt.s32.totalorder %s46_s18, %s46_s18 }
   0xc   :  { %p910_p3 = scmp.ne.s32.totalorder %s46_s18, %s909_s28  ;;  %p915_p5 = scmp.lt.s32.totalorder %s909_s28, %s909_s28 }
   0xe   :  { %p916_p6 = por %p915_p5, %p914_p4 }
  0x10   :  { %p917_p7 = pnand %p916_p6, %p910_p3 }
  0x12   :  { %920 = shalt.err (!%p917_p7)
}
  0x13   :  { %s1019_s29 = smov 64   ;;  %s1020_s30 = smov 4  }
  0x14   :  { %51 = dma.hbm_to_vmem [thread:$0]  %s1236_s5, 1024, %s46_s18, [#allocation6], %s1019_s29, %s1019_s29, %s1020_s30  }
  0x15   :  { %s921_s16 = scalar_lea.hbm %s1234_s3, 1024 }
  0x16   :  { %p922_p8 = scmp.ne.s32.totalorder %s1234_s3, %s921_s16  ;;  %p925_p9 = scmp.lt.u32.totalorder %s921_s16, %s1234_s3 }
  0x18   :  { %p927_p10 = pnand %p925_p9, %p922_p8 }
  0x1a   :  { %930 = shalt.err (!%p927_p10)
}
  0x1b   :  { %s931_s23 = scalar_lea.vmem %s1091_s20, 1024  ;;  %p936_p12 = scmp.lt.s32.totalorder %s1091_s20, %s1091_s20 }
  0x1c   :  { %p932_p11 = scmp.ne.s32.totalorder %s1091_s20, %s931_s23  ;;  %p937_p13 = scmp.lt.s32.totalorder %s931_s23, %s931_s23 }
  0x1e   :  { %p938_p0 = por %p937_p13, %p936_p12 }
  0x20   :  { %p939_p1 = pnand %p938_p0, %p932_p11 }
  0x22   :  { %942 = shalt.err (!%p939_p1)
}
  0x23   :  { %37 = dma.hbm_to_vmem [thread:$0]  %s1234_s3, 1024, %s1091_s20, [#allocation3], %s1019_s29, %s1019_s29, %s1020_s30  }
  0x24   :  { %s1021_s24 = smov [#allocation7]   ;;  %s1022_s26 = smov [#allocation8]  }
  0x25   :  { %s59_s25 = sshll.u32 %s1021_s24, 4  ;;  %s73_s27 = sshll.u32 %s1022_s26, 4  ;;  %s60_s25 = int_to_ptr.vmem [resolvable:$true] %s59_s25  ;;  %s1128_s27 = int_to_ptr.vmem [resolvable:$true] %s73_s27 }
  0x26   :  { %s943_s13 = scalar_lea.hbm %s1238_s7, 1024 }
  0x27   :  { %p944_p2 = scmp.ne.s32.totalorder %s1238_s7, %s943_s13  ;;  %p947_p3 = scmp.lt.u32.totalorder %s943_s13, %s1238_s7 }
  0x29   :  { %p949_p4 = pnand %p947_p3, %p944_p2 }
  0x2b   :  { %952 = shalt.err (!%p949_p4)
}
  0x2c   :  { %s953_s3 = scalar_lea.vmem %s60_s25, 1024  ;;  %p958_p6 = scmp.lt.s32.totalorder %s60_s25, %s60_s25 }
  0x2d   :  { %p954_p5 = scmp.ne.s32.totalorder %s60_s25, %s953_s3  ;;  %p959_p7 = scmp.lt.s32.totalorder %s953_s3, %s953_s3 }
  0x2f   :  { %p960_p8 = por %p959_p7, %p958_p6 }
  0x31   :  { %p961_p9 = pnand %p960_p8, %p954_p5 }
  0x33   :  { %964 = shalt.err (!%p961_p9)
}
  0x34   :  { %65 = dma.hbm_to_vmem [thread:$0]  %s1238_s7, 1024, %s60_s25, [#allocation6], %s1019_s29, %s1019_s29, %s1020_s30  }
  0x35   :  { %s965_s23 = scalar_lea.hbm %s1240_s9, 2048 }
  0x36   :  { %p966_p10 = scmp.ne.s32.totalorder %s1240_s9, %s965_s23  ;;  %p969_p11 = scmp.lt.u32.totalorder %s965_s23, %s1240_s9 }
  0x38   :  { %p971_p12 = pnand %p969_p11, %p966_p10 }
  0x3a   :  { %974 = shalt.err (!%p971_p12)
}
  0x3b   :  { %s975_s28 = scalar_lea.vmem %s1128_s27, 2048  ;;  %p980_p0 = scmp.lt.s32.totalorder %s1128_s27, %s1128_s27 }
  0x3c   :  { %p976_p13 = scmp.ne.s32.totalorder %s1128_s27, %s975_s28  ;;  %p981_p1 = scmp.lt.s32.totalorder %s975_s28, %s975_s28 }
  0x3e   :  { %p982_p2 = por %p981_p1, %p980_p0 }
  0x40   :  { %p983_p3 = pnand %p982_p2, %p976_p13 }
  0x42   :  { %986 = shalt.err (!%p983_p3)
}
  0x43   :  { %s1023_s7 = smov 128   ;;  %s1024_s29 = smov 8  }
  0x44   :  { %79 = dma.hbm_to_vmem [thread:$0]  %s1240_s9, 2048, %s1128_s27, [#allocation9], %s1023_s7, %s1023_s7, %s1024_s29  }
  0x45   :  { %1009 = dma.done.wait [#allocation3], 1024  }
  0x46   :  { %1010 = vsyncadd [#allocation3], 4294966272 }
  0x47   :  { %1011 = dma.done.wait [#allocation6], 2048  }
  0x48   :  { %1012 = vsyncadd [#allocation6], 4294965248 }
  0x49   :  { %1013 = dma.done.wait [#allocation9], 2048  }
  0x4a   :  { %1014 = vsyncadd [#allocation9], 4294965248  ;;  %v1025_v0 = vmov 0.0   ;;  %vm1026_vm0 = vmmov 0   ;;  %vm110_vm1 = vcmask 1043456   ;;  %v95_v2 = vld [vmem:[%s1231_s0] sm:$0xff] }
  0x4b   :  { %763 = vmatprep.subr.bf16.mxu0 %v1025_v0  ;;  %765 = vmatprep.mubr.msk.bf16.mxu0 %vm1026_vm0, %v1025_v0  ;;  %v98_v1 = vld [vmem:[%s1232_s1] sm:$0xf]  ;;  %v96_v3 = vld [vmem:[%s1231_s0 + $0x8] sm:$0xff]  ;;  %v843_v6 = vld [vmem:[#allocation2] sm:$0xff]   ;;  %vm106_vm2 = vcmask 64512  }
  0x4c   :  { %769 = vmatprep.subr.bf16.mxu1 %v1025_v0  ;;  %785 = vmatprep.mubr.msk.bf16.mxu1 %vm1026_vm0, %v1025_v0  ;;  %v112_v4 = vsel %vm110_vm1, %v98_v1, 0  ;;  %v97_v5 = vpack.c.bf16 %v96_v3, %v95_v2  ;;  %v844_v7 = vld [vmem:[#allocation2 + $0x8] sm:$0xff]   ;;  %v845_v8 = vld [vmem:[#allocation2 + $0x10] sm:$0xff]   ;;  %v846_v9 = vld [vmem:[#allocation2 + $0x18] sm:$0xff]  }
  0x4d   :  { %764 = vmatpush3.bf16.msra.mxu0 %v112_v4  ;;  %770 = vmatpush3.bf16.msra.mxu1 %v843_v6  ;;  %v847_v10 = vld [vmem:[#allocation2 + $0x20] sm:$0xff]   ;;  %v848_v11 = vld [vmem:[#allocation2 + $0x28] sm:$0xff]   ;;  %v849_v12 = vld [vmem:[#allocation2 + $0x30] sm:$0xff]  }
  0x4e   :  { %789 = vmatprep.subr.bf16.mxu0 %v1025_v0  ;;  %771 = vmatprep.subr.bf16.mxu1 %v1025_v0  ;;  %v850_v13 = vld [vmem:[#allocation2 + $0x38] sm:$0xff]   ;;  %v851_v14 = vld [vmem:[#allocation5] sm:$0xff]   ;;  %v852_v15 = vld [vmem:[#allocation5 + $0x8] sm:$0xff]  }
  0x4f   :  { %v853_v16 = vld [vmem:[#allocation5 + $0x10] sm:$0xff]   ;;  %v854_v17 = vld [vmem:[#allocation5 + $0x18] sm:$0xff]   ;;  %v855_v18 = vld [vmem:[#allocation5 + $0x20] sm:$0xff]  }
  0x50   :  { %766 = vmatmul.mubr.msk.bf16.vlgmr.msra.gmra.mrb[0].mxu0 %vm106_vm2, %v97_v5  ;;  %v856_v19 = vld [vmem:[#allocation5 + $0x28] sm:$0xff]   ;;  %v689_v20 = vld [vmem:[%s1233_s2] ss:$0 sm:$0xff]  ;;  %v858_v31 = vld [vmem:[#allocation5 + $0x38] sm:$0xff]  }
  0x51   :  { %805 = vmatprep.mubr.msk.bf16.mxu0 %vm1026_vm0, %v1025_v0  ;;  %772 = vmatpush3.bf16.msra.mxu1 %v844_v7  ;;  %v857_v30 = vld [vmem:[#allocation5 + $0x30] sm:$0xff]   ;;  %v859_v32 = vld [vmem:[#allocation7] sm:$0xff]   ;;  %v860_v33 = vld [vmem:[#allocation7 + $0x8] sm:$0xff]  }
  0x52   :  { %773 = vmatprep.subr.bf16.mxu1 %v1025_v0  ;;  %790 = vmatpush3.bf16.msra.mxu0 %v851_v14  ;;  %v861_v34 = vld [vmem:[#allocation7 + $0x10] sm:$0xff]   ;;  %v862_v35 = vld [vmem:[#allocation7 + $0x18] sm:$0xff]   ;;  %v863_v36 = vld [vmem:[#allocation7 + $0x20] sm:$0xff]  }
  0x53   :  { %791 = vmatprep.subr.bf16.mxu0 %v1025_v0  ;;  %v864_v37 = vld [vmem:[#allocation7 + $0x28] sm:$0xff]   ;;  %v691_v38 = vld [vmem:[%s1235_s4] ss:$0 sm:$0xff]  ;;  %v866_v49 = vld [vmem:[#allocation7 + $0x38] sm:$0xff]  }
  0x54   :  { %v865_v48 = vld [vmem:[#allocation7 + $0x30] sm:$0xff]   ;;  %v867_v50 = vld [vmem:[#allocation8] ss:$8 sps:$4 sm:$0xff]   ;;  %v869_v51 = vld [vmem:[#allocation8 + $0x4] ss:$8 sps:$4 sm:$0xff]  }
  0x55   :  { %774 = vmatpush3.bf16.msra.mxu1 %v845_v8  ;;  %v872_v52 = vld [vmem:[#allocation8 + $0x14] ss:$8 sps:$4 sm:$0xff]   ;;  %v870_v53 = vld [vmem:[#allocation8 + $0x10] ss:$8 sps:$4 sm:$0xff]   ;;  %v875_v54 = vld [vmem:[#allocation8 + $0x24] ss:$8 sps:$4 sm:$0xff]  }
  0x56   :  { %775 = vmatprep.subr.bf16.mxu1 %v1025_v0  ;;  %792 = vmatpush3.bf16.msra.mxu0 %v852_v15  ;;  %v873_v55 = vld [vmem:[#allocation8 + $0x20] ss:$8 sps:$4 sm:$0xff]   ;;  %v878_v56 = vld [vmem:[#allocation8 + $0x34] ss:$8 sps:$4 sm:$0xff]   ;;  %v876_v57 = vld [vmem:[#allocation8 + $0x30] ss:$8 sps:$4 sm:$0xff]  }
  0x57   :  { %793 = vmatprep.subr.bf16.mxu0 %v1025_v0  ;;  %v881_v58 = vld [vmem:[#allocation8 + $0x44] ss:$8 sps:$4 sm:$0xff]   ;;  %v879_v59 = vld [vmem:[#allocation8 + $0x40] ss:$8 sps:$4 sm:$0xff]   ;;  %v884_v60 = vld [vmem:[#allocation8 + $0x54] ss:$8 sps:$4 sm:$0xff]  }
  0x58   :  { %v882_v61 = vld [vmem:[#allocation8 + $0x50] ss:$8 sps:$4 sm:$0xff]   ;;  %v887_v8 = vld [vmem:[#allocation8 + $0x64] ss:$8 sps:$4 sm:$0xff]  }
  0x59   :  { %776 = vmatpush3.bf16.msra.mxu1 %v846_v9  ;;  %v700_v62 = vld [vmem:[%s1237_s6] ss:$0 sm:$0xff]  ;;  %v885_v9 = vld [vmem:[#allocation8 + $0x60] ss:$8 sps:$4 sm:$0xff]  }
  0x5a   :  { %777 = vmatprep.subr.bf16.mxu1 %v1025_v0  ;;  %794 = vmatpush3.bf16.msra.mxu0 %v853_v16 }
  0x5b   :  { %795 = vmatprep.subr.bf16.mxu0 %v1025_v0 }
  0x5d   :  { %778 = vmatpush3.bf16.msra.mxu1 %v847_v10  ;;  %v890_v10 = vld [vmem:[#allocation8 + $0x74] ss:$8 sps:$4 sm:$0xff]  }
  0x5e   :  { %779 = vmatprep.subr.bf16.mxu1 %v1025_v0  ;;  %796 = vmatpush3.bf16.msra.mxu0 %v854_v17 }
  0x5f   :  { %797 = vmatprep.subr.bf16.mxu0 %v1025_v0 }
  0x61   :  { %780 = vmatpush3.bf16.msra.mxu1 %v848_v11  ;;  %v888_v11 = vld [vmem:[#allocation8 + $0x70] ss:$8 sps:$4 sm:$0xff]  }
  0x62   :  { %781 = vmatprep.subr.bf16.mxu1 %v1025_v0  ;;  %798 = vmatpush3.bf16.msra.mxu0 %v855_v18 }
  0x63   :  { %799 = vmatprep.subr.bf16.mxu0 %v1025_v0 }
  0x65   :  { %782 = vmatpush3.bf16.msra.mxu1 %v849_v12  ;;  %v1027_v12 = vmov 0  }
  0x66   :  { %783 = vmatprep.subr.bf16.mxu1 %v1025_v0  ;;  %800 = vmatpush3.bf16.msra.mxu0 %v856_v19 }
  0x67   :  { %801 = vmatprep.subr.bf16.mxu0 %v1025_v0 }
  0x69   :  { %784 = vmatpush3.bf16.msra.mxu1 %v850_v13  ;;  %v709_v13 = vld [vmem:[%s1239_s8] ss:$0 sm:$0xff]  ;;  %s1028_s8 = smov [#allocation10]  }
  0x6a   :  { %809 = vmatprep.subr.bf16.mxu1 %v1025_v0  ;;  %802 = vmatpush3.bf16.msra.mxu0 %v857_v30 }
  0x6b   :  { %803 = vmatprep.subr.bf16.mxu0 %v1025_v0 }
  0x6e   :  { %804 = vmatpush3.bf16.msra.mxu0 %v858_v31 }
  0x6f   :  { %611 = vmatprep.subr.bf16.mxu0 %v869_v51 }
 0x123   :  { %v148_v21 = vpop.f32.mrb[0].mxu0 }
 0x124   :  { %v149_v22 = vadd.f32 %v689_v20, %v148_v21  ;;  %v767_v23 = vpop.f32.mrb[1].mxu0 }
 0x125   :  { %v151_v24 = vpop.f32.mrb[2].mxu0  ;;  %v521_v23 = vlaneseq }
 0x126   :  { %v152_v25 = vadd.f32 %v689_v20, %v151_v24  ;;  %v768_v26 = vpop.f32.mrb[3].mxu0  ;;  %v155_v27 = vmax.f32 %v149_v22, 0.0 }
 0x127   :  { %v522_v24 = vshrl.u32 %v521_v23, 7  ;;  %v519_v26 = vld [vmem:[%s1241_s10] sm:$0x3]  ;;  %s675_s10 = sshll.u32 %s1028_s8, 4  ;;  %s676_s10 = int_to_ptr.vmem [resolvable:$true] %s675_s10 }
 0x128   :  { %v156_v28 = vmax.f32 %v152_v25, 0.0  ;;  %s987_s21 = scalar_lea.vmem %s676_s10, 512  ;;  %p992_p5 = scmp.lt.s32.totalorder %s676_s10, %s676_s10 }
 0x129   :  { %v523_v25 = vsub.s32 0, %v522_v24  ;;  %p988_p4 = scmp.ne.s32.totalorder %s676_s10, %s987_s21  ;;  %p993_p6 = scmp.lt.s32.totalorder %s987_s21, %s987_s21 }
 0x12a   :  { %v157_v29 = vpack.c.bf16 %v156_v28, %v155_v27  ;;  %v527_v27 = vsub.s32 1, %v522_v24 }
 0x12b   :  { %v524_v28 = vrot.slane %v519_v26, %v523_v25  ;;  %p994_p7 = por %p993_p6, %p992_p5 }
 0x12c   :  { %786 = vmatmul.mubr.bf16.vlgmr.msra.gmra.mrb[0].mxu1 %v157_v29  ;;  %v528_v29 = vrot.slane %v519_v26, %v527_v27 }
 0x12d   :  { %825 = vmatprep.mubr.msk.bf16.mxu1 %vm1026_vm0, %v1025_v0  ;;  %810 = vmatpush3.bf16.msra.mxu1 %v859_v32  ;;  %p995_p8 = pnand %p994_p7, %p988_p4 }
 0x12e   :  { %811 = vmatprep.subr.bf16.mxu1 %v1025_v0 }
 0x131   :  { %812 = vmatpush3.bf16.msra.mxu1 %v860_v33 }
 0x132   :  { %813 = vmatprep.subr.bf16.mxu1 %v1025_v0 }
 0x135   :  { %814 = vmatpush3.bf16.msra.mxu1 %v861_v34 }
 0x136   :  { %815 = vmatprep.subr.bf16.mxu1 %v1025_v0 }
 0x139   :  { %816 = vmatpush3.bf16.msra.mxu1 %v862_v35 }
 0x13a   :  { %817 = vmatprep.subr.bf16.mxu1 %v1025_v0 }
 0x13d   :  { %818 = vmatpush3.bf16.msra.mxu1 %v863_v36 }
 0x13e   :  { %819 = vmatprep.subr.bf16.mxu1 %v1025_v0 }
 0x141   :  { %820 = vmatpush3.bf16.msra.mxu1 %v864_v37 }
 0x142   :  { %821 = vmatprep.subr.bf16.mxu1 %v1025_v0 }
 0x145   :  { %822 = vmatpush3.bf16.msra.mxu1 %v865_v48 }
 0x146   :  { %823 = vmatprep.subr.bf16.mxu1 %v1025_v0 }
 0x149   :  { %824 = vmatpush3.bf16.msra.mxu1 %v866_v49 }
 0x1ff   :  { %v263_v39 = vpop.f32.mrb[0].mxu1 }
 0x200   :  { %v264_v40 = vadd.f32 %v691_v38, %v263_v39  ;;  %v787_v41 = vpop.f32.mrb[1].mxu1 }
 0x201   :  { %v266_v42 = vpop.f32.mrb[2].mxu1 }
 0x202   :  { %v267_v43 = vadd.f32 %v691_v38, %v266_v42  ;;  %v788_v44 = vpop.f32.mrb[3].mxu1  ;;  %v270_v45 = vmax.f32 %v264_v40, 0.0 }
 0x204   :  { %v271_v46 = vmax.f32 %v267_v43, 0.0 }
 0x206   :  { %v272_v47 = vpack.c.bf16 %v271_v46, %v270_v45 }
 0x208   :  { %806 = vmatmul.mubr.bf16.vlgmr.msra.gmra.mrb[4].mxu0 %v272_v47 }
 0x209   :  { %612 = vmatpush1.bf16.msra.mxu0 %v867_v50  ;;  %643 = vmatprep.mubr.bf16.mxu0 %v1027_v12 }
 0x20a   :  { %613 = vmatprep.subr.bf16.mxu0 %v872_v52 }
 0x20d   :  { %614 = vmatpush1.bf16.msra.mxu0 %v870_v53 }
 0x20e   :  { %615 = vmatprep.subr.bf16.mxu0 %v875_v54 }
 0x211   :  { %616 = vmatpush1.bf16.msra.mxu0 %v873_v55 }
 0x212   :  { %617 = vmatprep.subr.bf16.mxu0 %v878_v56 }
 0x215   :  { %618 = vmatpush1.bf16.msra.mxu0 %v876_v57 }
 0x216   :  { %619 = vmatprep.subr.bf16.mxu0 %v881_v58 }
 0x219   :  { %620 = vmatpush1.bf16.msra.mxu0 %v879_v59 }
 0x21a   :  { %621 = vmatprep.subr.bf16.mxu0 %v884_v60 }
 0x21d   :  { %622 = vmatpush1.bf16.msra.mxu0 %v882_v61 }
 0x21e   :  { %623 = vmatprep.subr.bf16.mxu0 %v887_v8 }
 0x221   :  { %624 = vmatpush1.bf16.msra.mxu0 %v885_v9 }
 0x222   :  { %625 = vmatprep.subr.bf16.mxu0 %v890_v10 }
 0x225   :  { %626 = vmatpush1.bf16.msra.mxu0 %v888_v11 }
 0x2db   :  { %v378_v63 = vpop.f32.mrb[4].mxu0 }
 0x2dc   :  { %v379_v0 = vadd.f32 %v700_v62, %v378_v63  ;;  %v807_v1 = vpop.f32.mrb[5].mxu0 }
 0x2dd   :  { %v381_v2 = vpop.f32.mrb[6].mxu0 }
 0x2de   :  { %v382_v3 = vadd.f32 %v700_v62, %v381_v2  ;;  %v808_v4 = vpop.f32.mrb[7].mxu0  ;;  %v385_v5 = vmax.f32 %v379_v0, 0.0 }
 0x2e0   :  { %v386_v6 = vmax.f32 %v382_v3, 0.0 }
 0x2e2   :  { %v387_v7 = vpack.c.bf16 %v386_v6, %v385_v5 }
 0x2e4   :  { %826 = vmatmul.mubr.bf16.vlgmr.msra.gmra.mrb[4].mxu1 %v387_v7 }
 0x3b7   :  { %v493_v14 = vpop.f32.mrb[4].mxu1 }
 0x3b8   :  { %v494_v15 = vadd.f32 %v709_v13, %v493_v14  ;;  %v827_v16 = vpop.f32.mrb[5].mxu1 }
 0x3b9   :  { %v496_v17 = vpop.f32.mrb[6].mxu1 }
 0x3ba   :  { %v497_v18 = vadd.f32 %v709_v13, %v496_v17  ;;  %v828_v19 = vpop.f32.mrb[7].mxu1  ;;  %v500_v20 = vmax.f32 %v494_v15, 0.0 }
 0x3bc   :  { %v501_v21 = vmax.f32 %v497_v18, 0.0 }
 0x3be   :  { %v502_v22 = vpack.c.bf16 %v501_v21, %v500_v20 }
 0x3c0   :  { %644 = vmatmul.mubr.bf16.vlgmr.msra.gmra.mrb[8].mxu0 %v502_v22 }
 0x493   :  { %v645_v30 = vpop.f32.mrb[8].mxu0 }
 0x494   :  { %v646_v31 = vadd.f32 %v645_v30, %v524_v28  ;;  %v647_v32 = vpop.f32.mrb[9].mxu0 }
 0x495   :  { %v648_v33 = vadd.f32 %v647_v32, %v528_v29  ;;  %v649_v34 = vpop.f32.mrb[10].mxu0 }
 0x496   :  { %v654_v35 = vmul.f32 0.5, %v646_v31  ;;  %v650_v36 = vadd.f32 %v649_v34, %v524_v28  ;;  %v651_v37 = vpop.f32.mrb[11].mxu0 }
 0x497   :  { %v655_v38 = vmul.f32 0.5, %v648_v33  ;;  %v652_v39 = vadd.f32 %v651_v37, %v528_v29 }
 0x498   :  { %891 = vtanh.f32 %v654_v35  ;;  %v656_v40 = vmul.f32 0.5, %v650_v36 }
 0x499   :  { %893 = vtanh.f32 %v655_v38  ;;  %v657_v41 = vmul.f32 0.5, %v652_v39 }
 0x49a   :  { %895 = vtanh.f32 %v656_v40 }
 0x49b   :  { %897 = vtanh.f32 %v657_v41 }
 0x4a2   :  { %v892_v42 = vpop.eup %891 }
 0x4a3   :  { %v894_v43 = vpop.eup %893  ;;  %v662_v44 = vadd.f32 1.0, %v892_v42 }
 0x4a4   :  { %v896_v45 = vpop.eup %895  ;;  %v663_v46 = vadd.f32 1.0, %v894_v43 }
 0x4a5   :  { %v898_v47 = vpop.eup %897  ;;  %666 = vst [vmem:[#allocation10] sm:$0xff] %v662_v44  ;;  %v664_v48 = vadd.f32 1.0, %v896_v45 }
 0x4a6   :  { %667 = vst [vmem:[#allocation10 + $0x8] sm:$0xff] %v663_v46  ;;  %v665_v49 = vadd.f32 1.0, %v898_v47 }
 0x4a7   :  { %668 = vst [vmem:[#allocation10 + $0x10] sm:$0xff] %v664_v48 }
 0x4a8   :  { %669 = vst [vmem:[#allocation10 + $0x18] sm:$0xff] %v665_v49 }
 0x4a9   :  { %998 = shalt.err (!%p995_p8)
}
 0x4aa   :  { %s999_s5 = scalar_lea.hbm %s1242_s11, 512 }
 0x4ab   :  { %p1000_p9 = scmp.ne.s32.totalorder %s1242_s11, %s999_s5  ;;  %p1003_p10 = scmp.lt.u32.totalorder %s999_s5, %s1242_s11 }
 0x4ad   :  { %p1005_p11 = pnand %p1003_p10, %p1000_p9 }
 0x4af   :  { %1008 = shalt.err (!%p1005_p11)
}
 0x4b0   :  { %s1029_s7 = smov 256   ;;  %s1030_s29 = smov 16  }
 0x4b1   :  { %681 = dma.vmem_to_hbm [thread:$0]  %s676_s10, 512, %s1242_s11, [#allocation4], %s1029_s7, %s1029_s7, %s1030_s29  }
 0x4b2   :  { %1015 = dma.done.wait [#allocation4], 512  }
 0x4b3   :  { %1016 = vsyncadd [#allocation4], 4294966784 }
 0x4b4   :  { %685 = vsyncpa [#allocation3], 1 }
 0x4b5   :  { %686 = vsyncpa [#allocation6], 1 }
 0x4b6   :  { %687 = vsyncpa [#allocation9], 1 }
 0x4b7   :  { %688 = vsyncpa [#allocation4], 1 }

</bundles_post_ra>
